<compile_context>
chip_gen: v7x
topology: tpu7x:2x2x1
jax: 0.10.0
libtpu: 0.0.40
codegen_flags: <defaults>
</compile_context>

<pallas_src>
import functools

import jax
import jax.numpy as jnp
from jax.experimental import pallas as pl
from jax.experimental.pallas import tpu as pltpu


def _fused_mlp3_kernel(x_ref,
                       w1_ref, b1_ref,
                       wm_ref, bm_ref,
                       w2_ref, b2_ref,
                       o_ref):
    """Fused TwoLayerModel forward (folded form, 3 matmuls).

    x_ref is f32 (cast to bf16 here, on the VPU, hidden under the DMA);
    w*_ref are bf16 (prepared once, outside the hot path); biases are f32
    (1, N) rows.  Every matmul runs bf16 x bf16 -> f32 on the MXU; bias add
    and ReLU run in f32 on the VPU.
    """
    x = x_ref[...].astype(jnp.bfloat16)

    # layer0.fc1 + ReLU : (B, I) @ (I, H) -> f32
    h1 = jnp.dot(x, w1_ref[...], preferred_element_type=jnp.float32)
    h1 = jnp.maximum(h1 + b1_ref[...], 0.0)

    # folded (layer0.fc2 @ layer1.fc1) + ReLU : (B, H) @ (H, H) -> f32
    h2 = jnp.dot(h1.astype(jnp.bfloat16), wm_ref[...],
                 preferred_element_type=jnp.float32)
    h2 = jnp.maximum(h2 + bm_ref[...], 0.0)

    # layer1.fc2 : (B, H) @ (H, O) -> f32
    o = jnp.dot(h2.astype(jnp.bfloat16), w2_ref[...],
                preferred_element_type=jnp.float32)
    o_ref[...] = (o + b2_ref[...]).astype(o_ref.dtype)


def prepare_two_layer_params(layer0_params, layer1_params):
    """One-time (offline) parameter preparation.  NOT in the hot path.

    layerN_params = (w1, b1, w2, b2) with weights pre-transposed vs.
    nn.Linear.weight, i.e. w1: (num_input, num_hidden),
    w2: (num_hidden, num_output).  Requires num_output == num_input.

    Folds layer0.fc2 with layer1.fc1 (no nonlinearity between them) in f32,
    then casts weights to bf16 and reshapes biases to (1, N) f32 rows.
    """
    w1a, b1a, w2a, b2a = layer0_params
    w1b, b1b, w2b, b2b = layer1_params
    I, H = w1a.shape
    O = w2a.shape[1]
    assert O == I, "TwoLayerModel requires num_output == num_input"
    assert w1b.shape == (I, H) and w2b.shape == (H, O)

    # Fold in f32 (done once): out1 @ W1b + b1b == h @ (W2a@W1b) + (b2a@W1b + b1b)
    w_mid = jnp.dot(w2a, w1b, preferred_element_type=jnp.float32)      # (H, H)
    b_mid = jnp.dot(b2a, w1b, preferred_element_type=jnp.float32) + b1b  # (H,)

    return (
        w1a.astype(jnp.bfloat16),            # (I, H)
        b1a.astype(jnp.float32).reshape(1, H),
        w_mid.astype(jnp.bfloat16),          # (H, H)
        b_mid.astype(jnp.float32).reshape(1, H),
        w2b.astype(jnp.bfloat16),            # (H, O)
        b2b.astype(jnp.float32).reshape(1, O),
    )


@functools.partial(jax.jit, static_argnames=("out_dtype", "batch_block"))
def two_layer_model_forward(x, prepared_params, *, out_dtype=jnp.float32,
                            batch_block=256):
    """TwoLayerModel forward.  x: (B, num_input) f32; returns (B, num_output)."""
    w1, b1, wm, bm, w2, b2 = prepared_params
    B, I = x.shape
    H = w1.shape[1]
    O = w2.shape[1]
    assert w1.shape == (I, H) and wm.shape == (H, H) and w2.shape == (H, O)

    operands = (x, w1, b1, wm, bm, w2, b2)
    out_shape = jax.ShapeDtypeStruct((B, O), out_dtype)

    flops = 2 * B * (I * H + H * H + H * O)
    bytes_accessed = int(sum(int(a.size) * a.dtype.itemsize for a in operands)
                         + B * O * jnp.dtype(out_dtype).itemsize)
    cost = pl.CostEstimate(flops=flops, transcendentals=0,
                           bytes_accessed=bytes_accessed)

    use_grid = (B >= 2 * batch_block) and (B % batch_block == 0)

    if not use_grid:
        # Small batch: single shot, everything resident in VMEM, no grid
        # (per-grid-step overhead would dominate at this size).
        return pl.pallas_call(
            _fused_mlp3_kernel,
            out_shape=out_shape,
            in_specs=[pl.BlockSpec(memory_space=pltpu.MemorySpace.VMEM)
                      for _ in operands],
            out_specs=pl.BlockSpec(memory_space=pltpu.MemorySpace.VMEM),
            cost_estimate=cost,
        )(*operands)

    # Large batch: tile the batch axis (TM = batch_block) and mark it
    # "parallel" so both TensorCores on v7x get work; weights/biases are
    # whole-array blocks with a constant index_map (fetched once).
    tm = batch_block
    full = lambda i: (0, 0)  # noqa: E731
    return pl.pallas_call(
        _fused_mlp3_kernel,
        out_shape=out_shape,
        grid_spec=pltpu.PrefetchScalarGridSpec(
            num_scalar_prefetch=0,
            grid=(B // tm,),
            in_specs=[
                pl.BlockSpec((tm, I), lambda i: (i, 0)),   # x
                pl.BlockSpec((I, H), full),                # w1
                pl.BlockSpec((1, H), full),                # b1
                pl.BlockSpec((H, H), full),                # w_mid
                pl.BlockSpec((1, H), full),                # b_mid
                pl.BlockSpec((H, O), full),                # w2
                pl.BlockSpec((1, O), full),                # b2
            ],
            out_specs=pl.BlockSpec((tm, O), lambda i: (i, 0)),
        ),
        compiler_params=pltpu.CompilerParams(
            dimension_semantics=("parallel",)),
        cost_estimate=cost,
    )(*operands)


def _reference_same_recipe(x, prepared_params):
    """Pure-JAX reference replicating the kernel's exact numeric recipe."""
    w1, b1, wm, bm, w2, b2 = prepared_params
    h1 = jnp.dot(x.astype(jnp.bfloat16), w1,
                 preferred_element_type=jnp.float32) + b1
    h1 = jnp.maximum(h1, 0.0)
    h2 = jnp.dot(h1.astype(jnp.bfloat16), wm,
                 preferred_element_type=jnp.float32) + bm
    h2 = jnp.maximum(h2, 0.0)
    o = jnp.dot(h2.astype(jnp.bfloat16), w2,
                preferred_element_type=jnp.float32) + b2
    return o


def _reference_f32_sequential(x, layers):
    """Pure-f32 reference matching the original (unfolded) PyTorch module."""
    out = x
    for (w1, b1, w2, b2) in layers:
        h = jnp.maximum(jnp.dot(out, w1) + b1, 0.0)
        out = jnp.dot(h, w2) + b2
    return out


if __name__ == "__main__":
    # MXU/lane-aligned shapes; TwoLayerModel requires num_output == num_input
    # (layer1 consumes layer0's output).
    num_input, num_hidden, num_output = 128, 256, 128

    key = jax.random.PRNGKey(0)
    keys = jax.random.split(key, 10)

    def init_layer(k1, k2, k3, k4):
        # nn.Linear-style uniform(-1/sqrt(fan_in), 1/sqrt(fan_in)) init, with
        # weights stored pre-transposed as (in, out).
        bnd1 = 1.0 / (num_input ** 0.5)
        bnd2 = 1.0 / (num_hidden ** 0.5)
        w1 = jax.random.uniform(k1, (num_input, num_hidden), jnp.float32,
                                -bnd1, bnd1)
        b1 = jax.random.uniform(k2, (num_hidden,), jnp.float32, -bnd1, bnd1)
        w2 = jax.random.uniform(k3, (num_hidden, num_output), jnp.float32,
                                -bnd2, bnd2)
        b2 = jax.random.uniform(k4, (num_output,), jnp.float32, -bnd2, bnd2)
        return (w1, b1, w2, b2)

    layer0 = init_layer(keys[1], keys[2], keys[3], keys[4])
    layer1 = init_layer(keys[5], keys[6], keys[7], keys[8])

    # One-time parameter prep (fold + bf16 casts) — outside the hot path.
    prepared = prepare_two_layer_params(layer0, layer1)
    prepared = jax.block_until_ready(prepared)

    # --- small batch: gridless whole-array-VMEM path --------------------
    B_small = 128
    x_small = jax.random.normal(keys[0], (B_small, num_input), jnp.float32)
    out_small = jax.block_until_ready(two_layer_model_forward(x_small, prepared))
    assert out_small.shape == (B_small, num_output)
    ref_recipe = _reference_same_recipe(x_small, prepared)
    assert jnp.allclose(out_small, ref_recipe, atol=2e-3, rtol=2e-3), \
        "mismatch vs same-recipe reference (small B)"
    ref_f32 = _reference_f32_sequential(x_small, (layer0, layer1))
    assert jnp.allclose(out_small, ref_f32, atol=5e-2, rtol=5e-2), \
        "mismatch vs f32 sequential reference (small B)"

    # --- large batch: batch-tiled "parallel" grid path (v7x megacore) ----
    B_large = 1024
    x_large = jax.random.normal(keys[9], (B_large, num_input), jnp.float32)
    out_large = jax.block_until_ready(two_layer_model_forward(x_large, prepared))
    assert out_large.shape == (B_large, num_output)
    ref_recipe_l = _reference_same_recipe(x_large, prepared)
    assert jnp.allclose(out_large, ref_recipe_l, atol=2e-3, rtol=2e-3), \
        "mismatch vs same-recipe reference (large B)"
    ref_f32_l = _reference_f32_sequential(x_large, (layer0, layer1))
    assert jnp.allclose(out_large, ref_f32_l, atol=5e-2, rtol=5e-2), \
        "mismatch vs f32 sequential reference (large B)"

    print("KERNEL_OK")
</pallas_src>

<mosaic_0001>
module attributes {stable_mosaic.version = 11 : i64} {
  func.func @_fused_mlp3_kernel(%arg0: memref<128x128xf32, #tpu.memory_space<vmem>>, %arg1: memref<128x256xbf16, #tpu.memory_space<vmem>>, %arg2: memref<1x256xf32, #tpu.memory_space<vmem>>, %arg3: memref<256x256xbf16, #tpu.memory_space<vmem>>, %arg4: memref<1x256xf32, #tpu.memory_space<vmem>>, %arg5: memref<256x128xbf16, #tpu.memory_space<vmem>>, %arg6: memref<1x128xf32, #tpu.memory_space<vmem>>, %arg7: memref<128x128xf32, #tpu.memory_space<vmem>>) attributes {dimension_semantics = [], scalar_prefetch = 0 : i64, scratch_operands = 0 : i64, tpu.core_type = #tpu.core_type<tc>} {
    %c0 = arith.constant 0 : index
    %c0_0 = arith.constant 0 : index
    %0 = vector.load %arg0[%c0, %c0_0] : memref<128x128xf32, #tpu.memory_space<vmem>>, vector<128x128xf32>
    %1 = arith.truncf %0 : vector<128x128xf32> to vector<128x128xbf16>
    %c0_1 = arith.constant 0 : index
    %c0_2 = arith.constant 0 : index
    %2 = vector.load %arg1[%c0_1, %c0_2] : memref<128x256xbf16, #tpu.memory_space<vmem>>, vector<128x256xbf16>
    %cst = arith.constant dense<0.000000e+00> : vector<128x256xf32>
    %3 = tpu.matmul %1, %2, %cst {dimension_numbers = #tpu.dot_dimension_numbers<[1], [0], [0], [1], [0, 0, 1, 1], [], []>} : vector<128x128xbf16>, vector<128x256xbf16>, vector<128x256xf32> -> vector<128x256xf32>
    %c0_3 = arith.constant 0 : index
    %c0_4 = arith.constant 0 : index
    %4 = vector.load %arg2[%c0_3, %c0_4] : memref<1x256xf32, #tpu.memory_space<vmem>>, vector<1x256xf32>
    %5 = vector.broadcast %4 : vector<1x256xf32> to vector<128x256xf32>
    %6 = arith.addf %3, %5 : vector<128x256xf32>
    %cst_5 = arith.constant 0.000000e+00 : f32
    %7 = vector.broadcast %cst_5 : f32 to vector<128x256xf32>
    %8 = arith.maximumf %6, %7 : vector<128x256xf32>
    %9 = arith.truncf %8 : vector<128x256xf32> to vector<128x256xbf16>
    %c0_6 = arith.constant 0 : index
    %c0_7 = arith.constant 0 : index
    %10 = vector.load %arg3[%c0_6, %c0_7] : memref<256x256xbf16, #tpu.memory_space<vmem>>, vector<256x256xbf16>
    %cst_8 = arith.constant dense<0.000000e+00> : vector<128x256xf32>
    %11 = tpu.matmul %9, %10, %cst_8 {dimension_numbers = #tpu.dot_dimension_numbers<[1], [0], [0], [1], [0, 0, 1, 1], [], []>} : vector<128x256xbf16>, vector<256x256xbf16>, vector<128x256xf32> -> vector<128x256xf32>
    %c0_9 = arith.constant 0 : index
    %c0_10 = arith.constant 0 : index
    %12 = vector.load %arg4[%c0_9, %c0_10] : memref<1x256xf32, #tpu.memory_space<vmem>>, vector<1x256xf32>
    %13 = vector.broadcast %12 : vector<1x256xf32> to vector<128x256xf32>
    %14 = arith.addf %11, %13 : vector<128x256xf32>
    %cst_11 = arith.constant 0.000000e+00 : f32
    %15 = vector.broadcast %cst_11 : f32 to vector<128x256xf32>
    %16 = arith.maximumf %14, %15 : vector<128x256xf32>
    %17 = arith.truncf %16 : vector<128x256xf32> to vector<128x256xbf16>
    %c0_12 = arith.constant 0 : index
    %c0_13 = arith.constant 0 : index
    %18 = vector.load %arg5[%c0_12, %c0_13] : memref<256x128xbf16, #tpu.memory_space<vmem>>, vector<256x128xbf16>
    %cst_14 = arith.constant dense<0.000000e+00> : vector<128x128xf32>
    %19 = tpu.matmul %17, %18, %cst_14 {dimension_numbers = #tpu.dot_dimension_numbers<[1], [0], [0], [1], [0, 0, 1, 1], [], []>} : vector<128x256xbf16>, vector<256x128xbf16>, vector<128x128xf32> -> vector<128x128xf32>
    %c0_15 = arith.constant 0 : index
    %c0_16 = arith.constant 0 : index
    %20 = vector.load %arg6[%c0_15, %c0_16] : memref<1x128xf32, #tpu.memory_space<vmem>>, vector<1x128xf32>
    %21 = vector.broadcast %20 : vector<1x128xf32> to vector<128x128xf32>
    %22 = arith.addf %19, %21 : vector<128x128xf32>
    %c0_17 = arith.constant 0 : index
    %c0_18 = arith.constant 0 : index
    %23 = vector.load %arg7[%c0_17, %c0_18] : memref<128x128xf32, #tpu.memory_space<vmem>>, vector<128x128xf32>
    tpu.vector_store %arg7[%c0_17, %c0_18], %22 {strides = array<i32>} : memref<128x128xf32, #tpu.memory_space<vmem>>, vector<128x128xf32>,
    return
  }
}

</mosaic_0001>

<bundles_post_ra>
// kernel: two_layer_model_forward.1
= control target key start
LH: loop header
LB: loop body
LE: loop exit
PB: predicated region body
PF: predicated region fallthrough
CT: control target
= control target key end

     0   :  { %12 = vsyncpa [#allocation3], 0  ;;  %s1648_s0 = inlined_call_operand.hbm [shape: f32[128,128], index: 0, kind: input, shape index: {}]   ;;  %s1649_s1 = inlined_call_operand.hbm [shape: bf16[128,256], index: 1, kind: input, shape index: {}]   ;;  %s1650_s2 = inlined_call_operand.vmem [shape: f32[1,256], index: 2, kind: input, shape index: {}]   ;;  %s1651_s3 = inlined_call_operand.hbm [shape: bf16[256,256], index: 3, kind: input, shape index: {}]   ;;  %s1652_s4 = inlined_call_operand.vmem [shape: f32[1,256], index: 4, kind: input, shape index: {}]   ;;  %s1653_s5 = inlined_call_operand.hbm [shape: bf16[256,128], index: 5, kind: input, shape index: {}]   ;;  %s1654_s6 = inlined_call_operand.vmem [shape: f32[1,128], index: 6, kind: input, shape index: {}]   ;;  %s1655_s7 = inlined_call_operand.hbm [shape: f32[128,128], index: 7, kind: output, shape index: {}]  }
   0x1   :  { %13 = vsyncpa [#allocation6], 0 }
   0x2   :  { %14 = vsyncpa [#allocation9], 0 }
   0x3   :  { %15 = vsyncpa [#allocation4], 0  ;;  %s1369_s24 = smov [#allocation5]   ;;  %s1370_s26 = smov [#allocation2]  }
   0x4   :  { %s33_s25 = sshll.u32 %s1369_s24, 4  ;;  %s21_s27 = sshll.u32 %s1370_s26, 4  ;;  %s34_s25 = int_to_ptr.vmem [resolvable:$true] %s33_s25  ;;  %s1419_s27 = int_to_ptr.vmem [resolvable:$true] %s21_s27 }
   0x5   :  { %s1251_s30 = scalar_lea.hbm %s1649_s1, 2048 }
   0x6   :  { %p1252_p0 = scmp.ne.s32.totalorder %s1649_s1, %s1251_s30  ;;  %p1255_p1 = scmp.lt.u32.totalorder %s1251_s30, %s1649_s1 }
   0x8   :  { %p1257_p2 = pnand %p1255_p1, %p1252_p0 }
   0xa   :  { %1260 = shalt.err (!%p1257_p2)
}
   0xb   :  { %s1261_s12 = scalar_lea.vmem %s34_s25, 2048  ;;  %p1266_p4 = scmp.lt.s32.totalorder %s34_s25, %s34_s25 }
   0xc   :  { %p1262_p3 = scmp.ne.s32.totalorder %s34_s25, %s1261_s12  ;;  %p1267_p5 = scmp.lt.s32.totalorder %s1261_s12, %s1261_s12 }
   0xe   :  { %p1268_p6 = por %p1267_p5, %p1266_p4 }
  0x10   :  { %p1269_p7 = pnand %p1268_p6, %p1262_p3 }
  0x12   :  { %1272 = shalt.err (!%p1269_p7)
}
  0x13   :  { %s1371_s13 = smov 128   ;;  %s1372_s14 = smov 8  }
  0x14   :  { %39 = dma.hbm_to_vmem [thread:$0]  %s1649_s1, 2048, %s34_s25, [#allocation6], %s1371_s13, %s1371_s13, %s1372_s14  }
  0x15   :  { %s1273_s19 = scalar_lea.hbm %s1648_s0, 2048 }
  0x16   :  { %p1274_p8 = scmp.ne.s32.totalorder %s1648_s0, %s1273_s19  ;;  %p1277_p9 = scmp.lt.u32.totalorder %s1273_s19, %s1648_s0 }
  0x18   :  { %p1279_p10 = pnand %p1277_p9, %p1274_p8 }
  0x1a   :  { %1282 = shalt.err (!%p1279_p10)
}
  0x1b   :  { %s1283_s24 = scalar_lea.vmem %s1419_s27, 2048  ;;  %p1288_p12 = scmp.lt.s32.totalorder %s1419_s27, %s1419_s27 }
  0x1c   :  { %p1284_p11 = scmp.ne.s32.totalorder %s1419_s27, %s1283_s24  ;;  %p1289_p13 = scmp.lt.s32.totalorder %s1283_s24, %s1283_s24 }
  0x1e   :  { %p1290_p0 = por %p1289_p13, %p1288_p12 }
  0x20   :  { %p1291_p1 = pnand %p1290_p0, %p1284_p11 }
  0x22   :  { %1294 = shalt.err (!%p1291_p1)
}
  0x23   :  { %27 = dma.hbm_to_vmem [thread:$0]  %s1648_s0, 2048, %s1419_s27, [#allocation3], %s1371_s13, %s1371_s13, %s1372_s14  }
  0x24   :  { %s1373_s26 = smov [#allocation7]   ;;  %s1374_s29 = smov [#allocation8]  }
  0x25   :  { %s47_s28 = sshll.u32 %s1373_s26, 4  ;;  %s61_s30 = sshll.u32 %s1374_s29, 4  ;;  %s48_s28 = int_to_ptr.vmem [resolvable:$true] %s47_s28  ;;  %s1456_s30 = int_to_ptr.vmem [resolvable:$true] %s61_s30 }
  0x26   :  { %s1295_s10 = scalar_lea.hbm %s1651_s3, 4096 }
  0x27   :  { %p1296_p2 = scmp.ne.s32.totalorder %s1651_s3, %s1295_s10  ;;  %p1299_p3 = scmp.lt.u32.totalorder %s1295_s10, %s1651_s3 }
  0x29   :  { %p1301_p4 = pnand %p1299_p3, %p1296_p2 }
  0x2b   :  { %1304 = shalt.err (!%p1301_p4)
}
  0x2c   :  { %s1305_s0 = scalar_lea.vmem %s48_s28, 4096  ;;  %p1310_p6 = scmp.lt.s32.totalorder %s48_s28, %s48_s28 }
  0x2d   :  { %p1306_p5 = scmp.ne.s32.totalorder %s48_s28, %s1305_s0  ;;  %p1311_p7 = scmp.lt.s32.totalorder %s1305_s0, %s1305_s0 }
  0x2f   :  { %p1312_p8 = por %p1311_p7, %p1310_p6 }
  0x31   :  { %p1313_p9 = pnand %p1312_p8, %p1306_p5 }
  0x33   :  { %1316 = shalt.err (!%p1313_p9)
}
  0x34   :  { %53 = dma.hbm_to_vmem [thread:$0]  %s1651_s3, 4096, %s48_s28, [#allocation6], %s1371_s13, %s1371_s13, %s1372_s14  }
  0x35   :  { %s1317_s20 = scalar_lea.hbm %s1653_s5, 2048 }
  0x36   :  { %p1318_p10 = scmp.ne.s32.totalorder %s1653_s5, %s1317_s20  ;;  %p1321_p11 = scmp.lt.u32.totalorder %s1317_s20, %s1653_s5 }
  0x38   :  { %p1323_p12 = pnand %p1321_p11, %p1318_p10 }
  0x3a   :  { %1326 = shalt.err (!%p1323_p12)
}
  0x3b   :  { %s1327_s1 = scalar_lea.vmem %s1456_s30, 2048  ;;  %p1332_p0 = scmp.lt.s32.totalorder %s1456_s30, %s1456_s30 }
  0x3c   :  { %p1328_p13 = scmp.ne.s32.totalorder %s1456_s30, %s1327_s1  ;;  %p1333_p1 = scmp.lt.s32.totalorder %s1327_s1, %s1327_s1 }
  0x3e   :  { %p1334_p2 = por %p1333_p1, %p1332_p0 }
  0x40   :  { %p1335_p3 = pnand %p1334_p2, %p1328_p13 }
  0x42   :  { %1338 = shalt.err (!%p1335_p3)
}
  0x43   :  { %s1375_s3 = smov 64   ;;  %s1376_s25 = smov 4  }
  0x44   :  { %67 = dma.hbm_to_vmem [thread:$0]  %s1653_s5, 2048, %s1456_s30, [#allocation9], %s1375_s3, %s1375_s3, %s1376_s25  }
  0x45   :  { %1361 = dma.done.wait [#allocation3], 2048  }
  0x46   :  { %1362 = vsyncadd [#allocation3], 4294965248 }
  0x47   :  { %1363 = dma.done.wait [#allocation6], 6144  }
  0x48   :  { %1364 = vsyncadd [#allocation6], 4294961152 }
  0x49   :  { %1365 = dma.done.wait [#allocation9], 2048  }
  0x4a   :  { %1366 = vsyncadd [#allocation9], 4294965248  ;;  %v1377_v0 = vmov 0   ;;  %v1163_v1 = vld [vmem:[#allocation5 + $0x4] ss:$8 sps:$4 sm:$0xff]   ;;  %v85_v31 = vld [vmem:[#allocation2 + $0x10] sm:$0xff] }
  0x4b   :  { %247 = vmatprep.mubr.bf16.mxu0 %v1377_v0  ;;  %v1165_v2 = vld [vmem:[#allocation5] ss:$8 sps:$4 sm:$0xff]   ;;  %215 = vmatprep.subr.bf16.mxu0 %v1163_v1  ;;  %v1166_v3 = vld [vmem:[#allocation5 + $0x14] ss:$8 sps:$4 sm:$0xff]   ;;  %v1168_v4 = vld [vmem:[#allocation5 + $0x10] ss:$8 sps:$4 sm:$0xff]  }
  0x4c   :  { %216 = vmatpush1.bf16.msra.mxu0 %v1165_v2  ;;  %v1169_v5 = vld [vmem:[#allocation5 + $0x24] ss:$8 sps:$4 sm:$0xff]   ;;  %v1171_v6 = vld [vmem:[#allocation5 + $0x20] ss:$8 sps:$4 sm:$0xff]   ;;  %v1172_v7 = vld [vmem:[#allocation5 + $0x34] ss:$8 sps:$4 sm:$0xff]  }
  0x4d   :  { %217 = vmatprep.subr.bf16.mxu0 %v1166_v3  ;;  %v1174_v8 = vld [vmem:[#allocation5 + $0x30] ss:$8 sps:$4 sm:$0xff]   ;;  %v1175_v9 = vld [vmem:[#allocation5 + $0x44] ss:$8 sps:$4 sm:$0xff]   ;;  %v1177_v10 = vld [vmem:[#allocation5 + $0x40] ss:$8 sps:$4 sm:$0xff]  }
  0x4e   :  { %v1178_v11 = vld [vmem:[#allocation5 + $0x54] ss:$8 sps:$4 sm:$0xff]   ;;  %v1187_v12 = vld [vmem:[#allocation7 + $0x4] ss:$8 sps:$4 sm:$0xff]   ;;  %v1189_v13 = vld [vmem:[#allocation7] ss:$8 sps:$4 sm:$0xff]  }
  0x4f   :  { %v1180_v14 = vld [vmem:[#allocation5 + $0x50] ss:$8 sps:$4 sm:$0xff]   ;;  %580 = vmatprep.subr.bf16.mxu1 %v1187_v12  ;;  %v1190_v15 = vld [vmem:[#allocation7 + $0x14] ss:$8 sps:$4 sm:$0xff]   ;;  %v1181_v16 = vld [vmem:[#allocation5 + $0x64] ss:$8 sps:$4 sm:$0xff]  }
  0x50   :  { %218 = vmatpush1.bf16.msra.mxu0 %v1168_v4  ;;  %581 = vmatpush1.bf16.msra.mxu1 %v1189_v13  ;;  %v1192_v17 = vld [vmem:[#allocation7 + $0x10] ss:$8 sps:$4 sm:$0xff]   ;;  %v1193_v18 = vld [vmem:[#allocation7 + $0x24] ss:$8 sps:$4 sm:$0xff]   ;;  %v1183_v19 = vld [vmem:[#allocation5 + $0x60] ss:$8 sps:$4 sm:$0xff]  }
  0x51   :  { %219 = vmatprep.subr.bf16.mxu0 %v1169_v5  ;;  %582 = vmatprep.subr.bf16.mxu1 %v1190_v15  ;;  %v1184_v20 = vld [vmem:[#allocation5 + $0x74] ss:$8 sps:$4 sm:$0xff]   ;;  %v1195_v21 = vld [vmem:[#allocation7 + $0x20] ss:$8 sps:$4 sm:$0xff]   ;;  %v1186_v23 = vld [vmem:[#allocation5 + $0x70] ss:$8 sps:$4 sm:$0xff]  }
  0x52   :  { %v1196_v22 = vld [vmem:[#allocation7 + $0x34] ss:$8 sps:$4 sm:$0xff]   ;;  %v83_v24 = vld [vmem:[#allocation2] sm:$0xff]  ;;  %v84_v25 = vld [vmem:[#allocation2 + $0x8] sm:$0xff] }
  0x53   :  { %v1198_v26 = vld [vmem:[#allocation7 + $0x30] ss:$8 sps:$4 sm:$0xff]   ;;  %v1199_v27 = vld [vmem:[#allocation7 + $0x44] ss:$8 sps:$4 sm:$0xff]   ;;  %v99_v28 = vpack.c.bf16 %v84_v25, %v83_v24  ;;  %v1201_v29 = vld [vmem:[#allocation7 + $0x40] ss:$8 sps:$4 sm:$0xff]  }
  0x54   :  { %220 = vmatpush1.bf16.msra.mxu0 %v1171_v6  ;;  %583 = vmatpush1.bf16.msra.mxu1 %v1192_v17  ;;  %v1202_v30 = vld [vmem:[#allocation7 + $0x54] ss:$8 sps:$4 sm:$0xff]   ;;  %v1204_v33 = vld [vmem:[#allocation7 + $0x50] ss:$8 sps:$4 sm:$0xff]   ;;  %v1205_v34 = vld [vmem:[#allocation7 + $0x64] ss:$8 sps:$4 sm:$0xff]  }
  0x55   :  { %221 = vmatprep.subr.bf16.mxu0 %v1172_v7  ;;  %584 = vmatprep.subr.bf16.mxu1 %v1193_v18  ;;  %v86_v32 = vld [vmem:[#allocation2 + $0x18] sm:$0xff]  ;;  %v1207_v35 = vld [vmem:[#allocation7 + $0x60] ss:$8 sps:$4 sm:$0xff]   ;;  %v1211_v41 = vld [vmem:[#allocation7 + $0x84] ss:$8 sps:$4 sm:$0xff]  }
  0x56   :  { %v100_v36 = vpack.c.bf16 %v86_v32, %v85_v31  ;;  %v1208_v37 = vld [vmem:[#allocation7 + $0x74] ss:$8 sps:$4 sm:$0xff]   ;;  %v87_v38 = vld [vmem:[#allocation2 + $0x20] sm:$0xff]  ;;  %v88_v39 = vld [vmem:[#allocation2 + $0x28] sm:$0xff] }
  0x57   :  { %v1210_v40 = vld [vmem:[#allocation7 + $0x70] ss:$8 sps:$4 sm:$0xff]   ;;  %v101_v42 = vpack.c.bf16 %v88_v39, %v87_v38  ;;  %v1213_v43 = vld [vmem:[#allocation7 + $0x80] ss:$8 sps:$4 sm:$0xff]   ;;  %v1214_v44 = vld [vmem:[#allocation7 + $0x94] ss:$8 sps:$4 sm:$0xff]  }
  0x58   :  { %222 = vmatpush1.bf16.msra.mxu0 %v1174_v8  ;;  %585 = vmatpush1.bf16.msra.mxu1 %v1195_v21  ;;  %v89_v45 = vld [vmem:[#allocation2 + $0x30] sm:$0xff]  ;;  %v90_v46 = vld [vmem:[#allocation2 + $0x38] sm:$0xff]  ;;  %v1217_v48 = vld [vmem:[#allocation7 + $0xa4] ss:$8 sps:$4 sm:$0xff]  }
  0x59   :  { %223 = vmatprep.subr.bf16.mxu0 %v1175_v9  ;;  %586 = vmatprep.subr.bf16.mxu1 %v1196_v22  ;;  %v1216_v47 = vld [vmem:[#allocation7 + $0x90] ss:$8 sps:$4 sm:$0xff]   ;;  %v102_v49 = vpack.c.bf16 %v90_v46, %v89_v45  ;;  %v1219_v50 = vld [vmem:[#allocation7 + $0xa0] ss:$8 sps:$4 sm:$0xff]   ;;  %v1220_v51 = vld [vmem:[#allocation7 + $0xb4] ss:$8 sps:$4 sm:$0xff]  }
  0x5a   :  { %v91_v52 = vld [vmem:[#allocation2 + $0x40] sm:$0xff]  ;;  %v92_v53 = vld [vmem:[#allocation2 + $0x48] sm:$0xff]  ;;  %v1222_v54 = vld [vmem:[#allocation7 + $0xb0] ss:$8 sps:$4 sm:$0xff]  }
  0x5b   :  { %v1223_v55 = vld [vmem:[#allocation7 + $0xc4] ss:$8 sps:$4 sm:$0xff]   ;;  %v103_v56 = vpack.c.bf16 %v92_v53, %v91_v52  ;;  %v1225_v57 = vld [vmem:[#allocation7 + $0xc0] ss:$8 sps:$4 sm:$0xff]   ;;  %v1226_v58 = vld [vmem:[#allocation7 + $0xd4] ss:$8 sps:$4 sm:$0xff]  }
  0x5c   :  { %224 = vmatpush1.bf16.msra.mxu0 %v1177_v10  ;;  %587 = vmatpush1.bf16.msra.mxu1 %v1198_v26  ;;  %v93_v59 = vld [vmem:[#allocation2 + $0x50] sm:$0xff]  ;;  %v94_v60 = vld [vmem:[#allocation2 + $0x58] sm:$0xff]  ;;  %v95_v62 = vld [vmem:[#allocation2 + $0x60] sm:$0xff] }
  0x5d   :  { %225 = vmatprep.subr.bf16.mxu0 %v1178_v11  ;;  %588 = vmatprep.subr.bf16.mxu1 %v1199_v27  ;;  %v104_v61 = vpack.c.bf16 %v94_v60, %v93_v59  ;;  %v96_v63 = vld [vmem:[#allocation2 + $0x68] sm:$0xff]  ;;  %v97_v2 = vld [vmem:[#allocation2 + $0x70] sm:$0xff]  ;;  %v98_v3 = vld [vmem:[#allocation2 + $0x78] sm:$0xff] }
  0x5e   :  { %v105_v1 = vpack.c.bf16 %v96_v63, %v95_v62  ;;  %v106_v4 = vpack.c.bf16 %v98_v3, %v97_v2  ;;  %v1228_v5 = vld [vmem:[#allocation7 + $0xd0] ss:$8 sps:$4 sm:$0xff]   ;;  %v1229_v6 = vld [vmem:[#allocation7 + $0xe4] ss:$8 sps:$4 sm:$0xff]   ;;  %v1231_v7 = vld [vmem:[#allocation7 + $0xe0] ss:$8 sps:$4 sm:$0xff]  }
  0x5f   :  { %v1232_v8 = vld [vmem:[#allocation7 + $0xf4] ss:$8 sps:$4 sm:$0xff]   ;;  %v1234_v9 = vld [vmem:[#allocation7 + $0xf0] ss:$8 sps:$4 sm:$0xff]   ;;  %v1235_v10 = vld [vmem:[#allocation8 + $0x40] sm:$0xff]  }
  0x60   :  { %226 = vmatpush1.bf16.msra.mxu0 %v1180_v14  ;;  %589 = vmatpush1.bf16.msra.mxu1 %v1201_v29  ;;  %v1236_v11 = vld [vmem:[#allocation8] sm:$0xff]   ;;  %v1237_v12 = vld [vmem:[#allocation8 + $0x48] sm:$0xff]   ;;  %v1239_v13 = vld [vmem:[#allocation8 + $0x50] sm:$0xff]  }
  0x61   :  { %227 = vmatprep.subr.bf16.mxu0 %v1181_v16  ;;  %590 = vmatprep.subr.bf16.mxu1 %v1202_v30  ;;  %v1498_v14 = vld [vmem:[#allocation8 + $0x10] sm:$0xff]   ;;  %v1500_v15 = vld [vmem:[#allocation8 + $0x58] sm:$0xff]   ;;  %v1506_v17 = vld [vmem:[#allocation8 + $0x60] sm:$0xff]  }
  0x62   :  { %v1503_v16 = vld [vmem:[#allocation8 + $0x18] sm:$0xff]   ;;  %v1509_v18 = vld [vmem:[#allocation8 + $0x20] sm:$0xff]  }
  0x64   :  { %228 = vmatpush1.bf16.msra.mxu0 %v1183_v19  ;;  %591 = vmatpush1.bf16.msra.mxu1 %v1204_v33  ;;  %v1512_v19 = vld [vmem:[#allocation8 + $0x68] sm:$0xff]  }
  0x65   :  { %229 = vmatprep.subr.bf16.mxu0 %v1184_v20  ;;  %592 = vmatprep.subr.bf16.mxu1 %v1205_v34  ;;  %v125_v20 = vlaneseq }
  0x67   :  { %v1516_v21 = vshrl.u32 %v125_v20, 7 }
  0x68   :  { %230 = vmatpush1.bf16.msra.mxu0 %v1186_v23  ;;  %593 = vmatpush1.bf16.msra.mxu1 %v1207_v35  ;;  %v123_v23 = vld [vmem:[%s1650_s2] sm:$0x3] }
  0x69   :  { %594 = vmatprep.subr.bf16.mxu1 %v1208_v37  ;;  %1073 = vmatprep.subr.bf16.mxu0 %v1235_v10  ;;  %v127_v22 = vsub.s32 0, %v1516_v21  ;;  %v131_v24 = vsub.s32 1, %v1516_v21 }
  0x6b   :  { %248 = vmatmul.mubr.bf16.vlgmr.msra.gmra.mrb[0].mxu0 %v99_v28  ;;  %v1525_v25 = vrot.slane %v123_v23, %v127_v22  ;;  %v1529_v26 = vrot.slane %v123_v23, %v131_v24 }
  0x6c   :  { %257 = vmatprep.mubr.bf16.mxu0 %v1377_v0  ;;  %595 = vmatpush1.bf16.msra.mxu1 %v1210_v40 }
  0x6d   :  { %596 = vmatprep.subr.bf16.mxu1 %v1211_v41  ;;  %1074 = vmatpush3.bf16.msra.mxu0 %v1236_v11 }
  0x6e   :  { %1075 = vmatprep.subr.bf16.mxu0 %v1237_v12 }
  0x70   :  { %597 = vmatpush1.bf16.msra.mxu1 %v1213_v43 }
  0x71   :  { %598 = vmatprep.subr.bf16.mxu1 %v1214_v44 }
  0x73   :  { %258 = vmatmul.mubr.bf16.gmra.mrb[4].mxu0 %v100_v36 }
  0x74   :  { %267 = vmatprep.mubr.bf16.mxu0 %v1377_v0  ;;  %599 = vmatpush1.bf16.msra.mxu1 %v1216_v47 }
  0x75   :  { %600 = vmatprep.subr.bf16.mxu1 %v1217_v48 }
  0x78   :  { %601 = vmatpush1.bf16.msra.mxu1 %v1219_v50 }
  0x79   :  { %602 = vmatprep.subr.bf16.mxu1 %v1220_v51 }
  0x7b   :  { %268 = vmatmul.mubr.bf16.gmra.mrb[8].mxu0 %v101_v42 }
  0x7c   :  { %277 = vmatprep.mubr.bf16.mxu0 %v1377_v0  ;;  %603 = vmatpush1.bf16.msra.mxu1 %v1222_v54 }
  0x7d   :  { %604 = vmatprep.subr.bf16.mxu1 %v1223_v55 }
  0x80   :  { %605 = vmatpush1.bf16.msra.mxu1 %v1225_v57 }
  0x81   :  { %606 = vmatprep.subr.bf16.mxu1 %v1226_v58 }
  0x83   :  { %278 = vmatmul.mubr.bf16.gmra.mrb[12].mxu0 %v102_v49 }
  0x84   :  { %287 = vmatprep.mubr.bf16.mxu0 %v1377_v0  ;;  %607 = vmatpush1.bf16.msra.mxu1 %v1228_v5 }
  0x85   :  { %608 = vmatprep.subr.bf16.mxu1 %v1229_v6 }
  0x88   :  { %609 = vmatpush1.bf16.msra.mxu1 %v1231_v7 }
  0x89   :  { %610 = vmatprep.subr.bf16.mxu1 %v1232_v8 }
  0x8b   :  { %288 = vmatmul.mubr.bf16.gmra.mrb[16].mxu0 %v103_v56 }
  0x8c   :  { %297 = vmatprep.mubr.bf16.mxu0 %v1377_v0  ;;  %611 = vmatpush1.bf16.msra.mxu1 %v1234_v9 }
  0x8d   :  { %1137 = vmatprep.subr.bf16.mxu1 %v1235_v10 }
  0x93   :  { %298 = vmatmul.mubr.bf16.gmra.mrb[20].mxu0 %v104_v61 }
  0x94   :  { %307 = vmatprep.mubr.bf16.mxu0 %v1377_v0 }
  0x9b   :  { %308 = vmatmul.mubr.bf16.gmra.mrb[24].mxu0 %v105_v1 }
  0x9c   :  { %317 = vmatprep.mubr.bf16.mxu0 %v1377_v0  ;;  %v1238_v0 = vld [vmem:[#allocation8 + $0x8] sm:$0xff]  }
  0x9d   :  { %1076 = vmatpush3.bf16.msra.mxu0 %v1238_v0 }
  0x9e   :  { %1077 = vmatprep.subr.bf16.mxu0 %v1239_v13 }
  0xa1   :  { %1078 = vmatpush3.bf16.msra.mxu0 %v1498_v14 }
  0xa2   :  { %1079 = vmatprep.subr.bf16.mxu0 %v1500_v15 }
  0xa3   :  { %318 = vmatmul.mubr.bf16.gmra.mrb[28].mxu0 %v106_v4 }
  0xa5   :  { %1080 = vmatpush3.bf16.msra.mxu0 %v1503_v16 }
  0xa6   :  { %1081 = vmatprep.subr.bf16.mxu0 %v1506_v17 }
  0xa9   :  { %1082 = vmatpush3.bf16.msra.mxu0 %v1509_v18 }
  0xaa   :  { %1083 = vmatprep.subr.bf16.mxu0 %v1512_v19 }
 0x13e   :  { %v249_v27 = vpop.f32.mrb[0].mxu0 }
 0x13f   :  { %v250_v28 = vadd.f32 %v249_v27, %v1525_v25  ;;  %v251_v29 = vpop.f32.mrb[1].mxu0 }
 0x140   :  { %v252_v30 = vadd.f32 %v251_v29, %v1529_v26  ;;  %v253_v31 = vpop.f32.mrb[2].mxu0 }
 0x141   :  { %v254_v32 = vadd.f32 %v253_v31, %v1525_v25  ;;  %v255_v33 = vpop.f32.mrb[3].mxu0  ;;  %v328_v35 = vmax.f32 %v250_v28, 0.0 }
 0x142   :  { %v256_v34 = vadd.f32 %v255_v33, %v1529_v26  ;;  %v329_v37 = vmax.f32 %v252_v30, 0.0 }
 0x143   :  { %v330_v36 = vmax.f32 %v254_v32, 0.0 }
 0x144   :  { %v331_v38 = vmax.f32 %v256_v34, 0.0 }
 0x145   :  { %v360_v39 = vpack.c.bf16 %v330_v36, %v328_v35 }
 0x146   :  { %v259_v40 = vpop.f32.mrb[4].mxu0  ;;  %v361_v41 = vpack.c.bf16 %v331_v38, %v329_v37 }
 0x147   :  { %v260_v42 = vadd.f32 %v259_v40, %v1525_v25  ;;  %v261_v43 = vpop.f32.mrb[5].mxu0 }
 0x148   :  { %v262_v44 = vadd.f32 %v261_v43, %v1529_v26  ;;  %v263_v45 = vpop.f32.mrb[6].mxu0  ;;  %612 = vmatprep.mubr.bf16.mxu1 %v361_v41 }
 0x149   :  { %v264_v46 = vadd.f32 %v263_v45, %v1525_v25  ;;  %v265_v47 = vpop.f32.mrb[7].mxu0  ;;  %613 = vmatmul.mubr.bf16.vlgmr.msra.gmra.mrb[0].mxu1 %v360_v39  ;;  %v332_v49 = vmax.f32 %v260_v42, 0.0 }
 0x14a   :  { %v266_v48 = vadd.f32 %v265_v47, %v1529_v26  ;;  %1145 = vmatpush3.bf16.msra.mxu1 %v1236_v11  ;;  %v333_v51 = vmax.f32 %v262_v44, 0.0 }
 0x14b   :  { %v334_v50 = vmax.f32 %v264_v46, 0.0  ;;  %1138 = vmatprep.subr.bf16.mxu1 %v1237_v12 }
 0x14c   :  { %v335_v52 = vmax.f32 %v266_v48, 0.0 }
 0x14d   :  { %v362_v53 = vpack.c.bf16 %v334_v50, %v332_v49 }
 0x14e   :  { %v363_v54 = vpack.c.bf16 %v335_v52, %v333_v51  ;;  %v269_v55 = vpop.f32.mrb[8].mxu0  ;;  %1146 = vmatpush3.bf16.msra.mxu1 %v1238_v0 }
 0x14f   :  { %v270_v56 = vadd.f32 %v269_v55, %v1525_v25  ;;  %v271_v57 = vpop.f32.mrb[9].mxu0  ;;  %1139 = vmatprep.subr.bf16.mxu1 %v1239_v13 }
 0x150   :  { %v272_v58 = vadd.f32 %v271_v57, %v1529_v26  ;;  %v273_v59 = vpop.f32.mrb[10].mxu0  ;;  %622 = vmatprep.mubr.bf16.mxu1 %v363_v54 }
 0x151   :  { %v274_v60 = vadd.f32 %v273_v59, %v1525_v25  ;;  %v275_v61 = vpop.f32.mrb[11].mxu0  ;;  %623 = vmatmul.mubr.bf16.gmra.mrb[4].mxu1 %v362_v53  ;;  %v336_v63 = vmax.f32 %v270_v56, 0.0 }
 0x152   :  { %v276_v62 = vadd.f32 %v275_v61, %v1529_v26  ;;  %1147 = vmatpush3.bf16.msra.mxu1 %v1498_v14  ;;  %v337_v2 = vmax.f32 %v272_v58, 0.0 }
 0x153   :  { %v338_v1 = vmax.f32 %v274_v60, 0.0  ;;  %1140 = vmatprep.subr.bf16.mxu1 %v1500_v15 }
 0x154   :  { %v339_v3 = vmax.f32 %v276_v62, 0.0 }
 0x155   :  { %v364_v4 = vpack.c.bf16 %v338_v1, %v336_v63 }
 0x156   :  { %v365_v5 = vpack.c.bf16 %v339_v3, %v337_v2  ;;  %v279_v6 = vpop.f32.mrb[12].mxu0  ;;  %1148 = vmatpush3.bf16.msra.mxu1 %v1503_v16 }
 0x157   :  { %v280_v7 = vadd.f32 %v279_v6, %v1525_v25  ;;  %v281_v8 = vpop.f32.mrb[13].mxu0  ;;  %1141 = vmatprep.subr.bf16.mxu1 %v1506_v17 }
 0x158   :  { %v282_v9 = vadd.f32 %v281_v8, %v1529_v26  ;;  %v283_v10 = vpop.f32.mrb[14].mxu0  ;;  %632 = vmatprep.mubr.bf16.mxu1 %v365_v5 }
 0x159   :  { %v284_v11 = vadd.f32 %v283_v10, %v1525_v25  ;;  %v285_v12 = vpop.f32.mrb[15].mxu0  ;;  %633 = vmatmul.mubr.bf16.gmra.mrb[8].mxu1 %v364_v4  ;;  %v340_v13 = vmax.f32 %v280_v7, 0.0 }
 0x15a   :  { %v286_v0 = vadd.f32 %v285_v12, %v1529_v26  ;;  %1149 = vmatpush3.bf16.msra.mxu1 %v1509_v18  ;;  %v341_v15 = vmax.f32 %v282_v9, 0.0 }
 0x15b   :  { %v342_v14 = vmax.f32 %v284_v11, 0.0  ;;  %1142 = vmatprep.subr.bf16.mxu1 %v1512_v19 }
 0x15c   :  { %v343_v16 = vmax.f32 %v286_v0, 0.0 }
 0x15d   :  { %v366_v20 = vpack.c.bf16 %v342_v14, %v340_v13 }
 0x15e   :  { %v367_v17 = vpack.c.bf16 %v343_v16, %v341_v15  ;;  %v289_v23 = vpop.f32.mrb[16].mxu0  ;;  %v1246_v16 = vld [vmem:[#allocation8 + $0x28] sm:$0xff]  }
 0x15f   :  { %v290_v27 = vadd.f32 %v289_v23, %v1525_v25  ;;  %v291_v28 = vpop.f32.mrb[17].mxu0  ;;  %1084 = vmatpush3.bf16.msra.mxu0 %v1246_v16  ;;  %1150 = vmatpush3.bf16.msra.mxu1 %v1246_v16  ;;  %v1250_v23 = vld [vmem:[#allocation8 + $0x38] sm:$0xff]  }
 0x160   :  { %v292_v29 = vadd.f32 %v291_v28, %v1529_v26  ;;  %v293_v30 = vpop.f32.mrb[18].mxu0  ;;  %642 = vmatprep.mubr.bf16.mxu1 %v367_v17  ;;  %v1248_v17 = vld [vmem:[#allocation8 + $0x30] sm:$0xff]  }
 0x161   :  { %v294_v31 = vadd.f32 %v293_v30, %v1525_v25  ;;  %v295_v32 = vpop.f32.mrb[19].mxu0  ;;  %643 = vmatmul.mubr.bf16.gmra.mrb[12].mxu1 %v366_v20  ;;  %v344_v33 = vmax.f32 %v290_v27, 0.0  ;;  %v1247_v20 = vld [vmem:[#allocation8 + $0x70] sm:$0xff]  }
 0x162   :  { %v296_v18 = vadd.f32 %v295_v32, %v1529_v26  ;;  %v345_v34 = vmax.f32 %v292_v29, 0.0  ;;  %1085 = vmatprep.subr.bf16.mxu0 %v1247_v20  ;;  %1143 = vmatprep.subr.bf16.mxu1 %v1247_v20 }
 0x163   :  { %v346_v19 = vmax.f32 %v294_v31, 0.0  ;;  %1086 = vmatpush3.bf16.msra.mxu0 %v1248_v17  ;;  %1151 = vmatpush3.bf16.msra.mxu1 %v1248_v17 }
 0x164   :  { %v347_v35 = vmax.f32 %v296_v18, 0.0 }
 0x165   :  { %v368_v36 = vpack.c.bf16 %v346_v19, %v344_v33 }
 0x166   :  { %v369_v37 = vpack.c.bf16 %v347_v35, %v345_v34  ;;  %v299_v38 = vpop.f32.mrb[20].mxu0 }
 0x167   :  { %v300_v39 = vadd.f32 %v299_v38, %v1525_v25  ;;  %v301_v40 = vpop.f32.mrb[21].mxu0 }
 0x168   :  { %v302_v41 = vadd.f32 %v301_v40, %v1529_v26  ;;  %v303_v42 = vpop.f32.mrb[22].mxu0  ;;  %652 = vmatprep.mubr.bf16.mxu1 %v369_v37 }
 0x169   :  { %v304_v43 = vadd.f32 %v303_v42, %v1525_v25  ;;  %v305_v44 = vpop.f32.mrb[23].mxu0  ;;  %653 = vmatmul.mubr.bf16.gmra.mrb[16].mxu1 %v368_v36  ;;  %v348_v46 = vmax.f32 %v300_v39, 0.0 }
 0x16a   :  { %v306_v45 = vadd.f32 %v305_v44, %v1529_v26  ;;  %v349_v48 = vmax.f32 %v302_v41, 0.0 }
 0x16b   :  { %v350_v47 = vmax.f32 %v304_v43, 0.0 }
 0x16c   :  { %v351_v49 = vmax.f32 %v306_v45, 0.0 }
 0x16d   :  { %v370_v50 = vpack.c.bf16 %v350_v47, %v348_v46 }
 0x16e   :  { %v371_v51 = vpack.c.bf16 %v351_v49, %v349_v48  ;;  %v309_v52 = vpop.f32.mrb[24].mxu0 }
 0x16f   :  { %v310_v53 = vadd.f32 %v309_v52, %v1525_v25  ;;  %v311_v54 = vpop.f32.mrb[25].mxu0 }
 0x170   :  { %v312_v55 = vadd.f32 %v311_v54, %v1529_v26  ;;  %v313_v56 = vpop.f32.mrb[26].mxu0  ;;  %662 = vmatprep.mubr.bf16.mxu1 %v371_v51 }
 0x171   :  { %v314_v57 = vadd.f32 %v313_v56, %v1525_v25  ;;  %v315_v58 = vpop.f32.mrb[27].mxu0  ;;  %663 = vmatmul.mubr.bf16.gmra.mrb[20].mxu1 %v370_v50  ;;  %v352_v60 = vmax.f32 %v310_v53, 0.0 }
 0x172   :  { %v316_v59 = vadd.f32 %v315_v58, %v1529_v26  ;;  %v353_v62 = vmax.f32 %v312_v55, 0.0 }
 0x173   :  { %v354_v61 = vmax.f32 %v314_v57, 0.0 }
 0x174   :  { %v355_v63 = vmax.f32 %v316_v59, 0.0 }
 0x175   :  { %v372_v1 = vpack.c.bf16 %v354_v61, %v352_v60 }
 0x176   :  { %v373_v2 = vpack.c.bf16 %v355_v63, %v353_v62  ;;  %v319_v3 = vpop.f32.mrb[28].mxu0 }
 0x177   :  { %v320_v4 = vadd.f32 %v319_v3, %v1525_v25  ;;  %v321_v5 = vpop.f32.mrb[29].mxu0 }
 0x178   :  { %v322_v6 = vadd.f32 %v321_v5, %v1529_v26  ;;  %v323_v7 = vpop.f32.mrb[30].mxu0  ;;  %672 = vmatprep.mubr.bf16.mxu1 %v373_v2 }
 0x179   :  { %v324_v8 = vadd.f32 %v323_v7, %v1525_v25  ;;  %v325_v9 = vpop.f32.mrb[31].mxu0  ;;  %673 = vmatmul.mubr.bf16.gmra.mrb[24].mxu1 %v372_v1  ;;  %v356_v11 = vmax.f32 %v320_v4, 0.0  ;;  %v1249_v25 = vld [vmem:[#allocation8 + $0x78] sm:$0xff]  }
 0x17a   :  { %v326_v10 = vadd.f32 %v325_v9, %v1529_v26  ;;  %v357_v0 = vmax.f32 %v322_v6, 0.0  ;;  %1087 = vmatprep.subr.bf16.mxu0 %v1249_v25  ;;  %1144 = vmatprep.subr.bf16.mxu1 %v1249_v25  ;;  %v408_v26 = vld [vmem:[%s1652_s4] sm:$0x3] }
 0x17b   :  { %v358_v12 = vmax.f32 %v324_v8, 0.0  ;;  %1088 = vmatpush3.bf16.msra.mxu0 %v1250_v23  ;;  %1152 = vmatpush3.bf16.msra.mxu1 %v1250_v23  ;;  %v1574_v27 = vrot.slane %v408_v26, %v127_v22  ;;  %v1578_v28 = vrot.slane %v408_v26, %v131_v24 }
 0x17c   :  { %v359_v13 = vmax.f32 %v326_v10, 0.0 }
 0x17d   :  { %v374_v14 = vpack.c.bf16 %v358_v12, %v356_v11 }
 0x17e   :  { %v375_v15 = vpack.c.bf16 %v359_v13, %v357_v0 }
 0x180   :  { %682 = vmatprep.mubr.bf16.mxu1 %v375_v15 }
 0x181   :  { %683 = vmatmul.mubr.bf16.gmra.mrb[28].mxu1 %v374_v14 }
 0x21c   :  { %v614_v29 = vpop.f32.mrb[0].mxu1 }
 0x21d   :  { %v615_v30 = vadd.f32 %v614_v29, %v1574_v27  ;;  %v616_v31 = vpop.f32.mrb[1].mxu1 }
 0x21e   :  { %v617_v32 = vadd.f32 %v616_v31, %v1578_v28  ;;  %v618_v18 = vpop.f32.mrb[2].mxu1 }
 0x21f   :  { %v619_v33 = vadd.f32 %v618_v18, %v1574_v27  ;;  %v620_v19 = vpop.f32.mrb[3].mxu1  ;;  %v693_v35 = vmax.f32 %v615_v30, 0.0 }
 0x220   :  { %v621_v34 = vadd.f32 %v620_v19, %v1578_v28  ;;  %v694_v22 = vmax.f32 %v617_v32, 0.0 }
 0x221   :  { %v695_v36 = vmax.f32 %v619_v33, 0.0 }
 0x222   :  { %v696_v37 = vmax.f32 %v621_v34, 0.0 }
 0x223   :  { %v725_v38 = vpack.c.bf16 %v695_v36, %v693_v35 }
 0x224   :  { %v726_v21 = vpack.c.bf16 %v696_v37, %v694_v22  ;;  %v624_v24 = vpop.f32.mrb[4].mxu1 }
 0x225   :  { %v625_v39 = vadd.f32 %v624_v24, %v1574_v27  ;;  %v626_v40 = vpop.f32.mrb[5].mxu1 }
 0x226   :  { %v627_v41 = vadd.f32 %v626_v40, %v1578_v28  ;;  %v628_v42 = vpop.f32.mrb[6].mxu1  ;;  %908 = vmatprep.mubr.bf16.mxu0 %v726_v21 }
 0x227   :  { %v629_v43 = vadd.f32 %v628_v42, %v1574_v27  ;;  %v630_v44 = vpop.f32.mrb[7].mxu1  ;;  %909 = vmatmul.mubr.bf16.vlgmr.msra.gmra.mrb[32].mxu0 %v725_v38  ;;  %v697_v46 = vmax.f32 %v625_v39, 0.0 }
 0x228   :  { %v631_v45 = vadd.f32 %v630_v44, %v1578_v28  ;;  %v698_v48 = vmax.f32 %v627_v41, 0.0 }
 0x229   :  { %v699_v47 = vmax.f32 %v629_v43, 0.0 }
 0x22a   :  { %v700_v49 = vmax.f32 %v631_v45, 0.0 }
 0x22b   :  { %v727_v50 = vpack.c.bf16 %v699_v47, %v697_v46 }
 0x22c   :  { %v728_v51 = vpack.c.bf16 %v700_v49, %v698_v48  ;;  %v634_v52 = vpop.f32.mrb[8].mxu1 }
 0x22d   :  { %v635_v53 = vadd.f32 %v634_v52, %v1574_v27  ;;  %v636_v54 = vpop.f32.mrb[9].mxu1 }
 0x22e   :  { %v637_v55 = vadd.f32 %v636_v54, %v1578_v28  ;;  %v638_v56 = vpop.f32.mrb[10].mxu1  ;;  %916 = vmatprep.mubr.bf16.mxu0 %v728_v51 }
 0x22f   :  { %v639_v57 = vadd.f32 %v638_v56, %v1574_v27  ;;  %v640_v58 = vpop.f32.mrb[11].mxu1  ;;  %917 = vmatmul.mubr.bf16.gmra.mrb[36].mxu0 %v727_v50  ;;  %v701_v60 = vmax.f32 %v635_v53, 0.0 }
 0x230   :  { %v641_v59 = vadd.f32 %v640_v58, %v1578_v28  ;;  %v702_v62 = vmax.f32 %v637_v55, 0.0 }
 0x231   :  { %v703_v61 = vmax.f32 %v639_v57, 0.0 }
 0x232   :  { %v704_v63 = vmax.f32 %v641_v59, 0.0 }
 0x233   :  { %v729_v1 = vpack.c.bf16 %v703_v61, %v701_v60 }
 0x234   :  { %v730_v2 = vpack.c.bf16 %v704_v63, %v702_v62  ;;  %v644_v3 = vpop.f32.mrb[12].mxu1 }
 0x235   :  { %v645_v4 = vadd.f32 %v644_v3, %v1574_v27  ;;  %v646_v5 = vpop.f32.mrb[13].mxu1 }
 0x236   :  { %v647_v6 = vadd.f32 %v646_v5, %v1578_v28  ;;  %v648_v7 = vpop.f32.mrb[14].mxu1  ;;  %924 = vmatprep.mubr.bf16.mxu0 %v730_v2 }
 0x237   :  { %v649_v8 = vadd.f32 %v648_v7, %v1574_v27  ;;  %v650_v9 = vpop.f32.mrb[15].mxu1  ;;  %925 = vmatmul.mubr.bf16.gmra.mrb[40].mxu0 %v729_v1  ;;  %v705_v11 = vmax.f32 %v645_v4, 0.0 }
 0x238   :  { %v651_v10 = vadd.f32 %v650_v9, %v1578_v28  ;;  %v706_v0 = vmax.f32 %v647_v6, 0.0 }
 0x239   :  { %v707_v12 = vmax.f32 %v649_v8, 0.0 }
 0x23a   :  { %v708_v13 = vmax.f32 %v651_v10, 0.0 }
 0x23b   :  { %v731_v14 = vpack.c.bf16 %v707_v12, %v705_v11  ;;  %v1615_v12 = vld [vmem:[%s1654_s6] ss:$0 sm:$0xff]  ;;  %s1378_s6 = smov [#allocation10]  }
 0x23c   :  { %v732_v15 = vpack.c.bf16 %v708_v13, %v706_v0  ;;  %v654_v16 = vpop.f32.mrb[16].mxu1  ;;  %s994_s9 = sshll.u32 %s1378_s6, 4  ;;  %s995_s9 = int_to_ptr.vmem [resolvable:$true] %s994_s9 }
 0x23d   :  { %v655_v20 = vadd.f32 %v654_v16, %v1574_v27  ;;  %v656_v17 = vpop.f32.mrb[17].mxu1  ;;  %s1339_s10 = scalar_lea.vmem %s995_s9, 2048  ;;  %p1344_p5 = scmp.lt.s32.totalorder %s995_s9, %s995_s9 }
 0x23e   :  { %v657_v25 = vadd.f32 %v656_v17, %v1578_v28  ;;  %v658_v23 = vpop.f32.mrb[18].mxu1  ;;  %932 = vmatprep.mubr.bf16.mxu0 %v732_v15  ;;  %p1340_p4 = scmp.ne.s32.totalorder %s995_s9, %s1339_s10  ;;  %p1345_p6 = scmp.lt.s32.totalorder %s1339_s10, %s1339_s10 }
 0x23f   :  { %v659_v26 = vadd.f32 %v658_v23, %v1574_v27  ;;  %v660_v29 = vpop.f32.mrb[19].mxu1  ;;  %933 = vmatmul.mubr.bf16.gmra.mrb[44].mxu0 %v731_v14  ;;  %v709_v31 = vmax.f32 %v655_v20, 0.0 }
 0x240   :  { %v661_v30 = vadd.f32 %v660_v29, %v1578_v28  ;;  %v710_v18 = vmax.f32 %v657_v25, 0.0  ;;  %p1346_p7 = por %p1345_p6, %p1344_p5 }
 0x241   :  { %v711_v32 = vmax.f32 %v659_v26, 0.0 }
 0x242   :  { %v712_v33 = vmax.f32 %v661_v30, 0.0  ;;  %p1347_p8 = pnand %p1346_p7, %p1340_p4 }
 0x243   :  { %v733_v19 = vpack.c.bf16 %v711_v32, %v709_v31 }
 0x244   :  { %v734_v34 = vpack.c.bf16 %v712_v33, %v710_v18  ;;  %v664_v35 = vpop.f32.mrb[20].mxu1 }
 0x245   :  { %v665_v36 = vadd.f32 %v664_v35, %v1574_v27  ;;  %v666_v22 = vpop.f32.mrb[21].mxu1 }
 0x246   :  { %v667_v37 = vadd.f32 %v666_v22, %v1578_v28  ;;  %v668_v38 = vpop.f32.mrb[22].mxu1  ;;  %940 = vmatprep.mubr.bf16.mxu0 %v734_v34 }
 0x247   :  { %v669_v21 = vadd.f32 %v668_v38, %v1574_v27  ;;  %v670_v24 = vpop.f32.mrb[23].mxu1  ;;  %941 = vmatmul.mubr.bf16.gmra.mrb[48].mxu0 %v733_v19  ;;  %v713_v40 = vmax.f32 %v665_v36, 0.0 }
 0x248   :  { %v671_v39 = vadd.f32 %v670_v24, %v1578_v28  ;;  %v714_v42 = vmax.f32 %v667_v37, 0.0 }
 0x249   :  { %v715_v41 = vmax.f32 %v669_v21, 0.0 }
 0x24a   :  { %v716_v43 = vmax.f32 %v671_v39, 0.0 }
 0x24b   :  { %v735_v44 = vpack.c.bf16 %v715_v41, %v713_v40 }
 0x24c   :  { %v736_v45 = vpack.c.bf16 %v716_v43, %v714_v42  ;;  %v674_v46 = vpop.f32.mrb[24].mxu1 }
 0x24d   :  { %v675_v47 = vadd.f32 %v674_v46, %v1574_v27  ;;  %v676_v48 = vpop.f32.mrb[25].mxu1 }
 0x24e   :  { %v677_v49 = vadd.f32 %v676_v48, %v1578_v28  ;;  %v678_v50 = vpop.f32.mrb[26].mxu1  ;;  %948 = vmatprep.mubr.bf16.mxu0 %v736_v45 }
 0x24f   :  { %v679_v51 = vadd.f32 %v678_v50, %v1574_v27  ;;  %v680_v52 = vpop.f32.mrb[27].mxu1  ;;  %949 = vmatmul.mubr.bf16.gmra.mrb[52].mxu0 %v735_v44  ;;  %v717_v54 = vmax.f32 %v675_v47, 0.0 }
 0x250   :  { %v681_v53 = vadd.f32 %v680_v52, %v1578_v28  ;;  %v718_v56 = vmax.f32 %v677_v49, 0.0 }
 0x251   :  { %v719_v55 = vmax.f32 %v679_v51, 0.0 }
 0x252   :  { %v720_v57 = vmax.f32 %v681_v53, 0.0 }
 0x253   :  { %v737_v58 = vpack.c.bf16 %v719_v55, %v717_v54 }
 0x254   :  { %v738_v59 = vpack.c.bf16 %v720_v57, %v718_v56  ;;  %v684_v60 = vpop.f32.mrb[28].mxu1 }
 0x255   :  { %v685_v61 = vadd.f32 %v684_v60, %v1574_v27  ;;  %v686_v62 = vpop.f32.mrb[29].mxu1 }
 0x256   :  { %v687_v63 = vadd.f32 %v686_v62, %v1578_v28  ;;  %v688_v1 = vpop.f32.mrb[30].mxu1  ;;  %956 = vmatprep.mubr.bf16.mxu1 %v738_v59 }
 0x257   :  { %v689_v2 = vadd.f32 %v688_v1, %v1574_v27  ;;  %v690_v3 = vpop.f32.mrb[31].mxu1  ;;  %957 = vmatmul.mubr.bf16.vlgmr.msra.gmra.mrb[32].mxu1 %v737_v58  ;;  %v721_v5 = vmax.f32 %v685_v61, 0.0 }
 0x258   :  { %v691_v4 = vadd.f32 %v690_v3, %v1578_v28  ;;  %v722_v7 = vmax.f32 %v687_v63, 0.0 }
 0x259   :  { %v723_v6 = vmax.f32 %v689_v2, 0.0 }
 0x25a   :  { %v724_v8 = vmax.f32 %v691_v4, 0.0 }
 0x25b   :  { %v739_v9 = vpack.c.bf16 %v723_v6, %v721_v5 }
 0x25c   :  { %v740_v10 = vpack.c.bf16 %v724_v8, %v722_v7 }
 0x25e   :  { %964 = vmatprep.mubr.bf16.mxu1 %v740_v10 }
 0x25f   :  { %965 = vmatmul.mubr.bf16.gmra.mrb[36].mxu1 %v739_v9 }
 0x2fa   :  { %v1089_v11 = vpop.f32.mrb[32].mxu0 }
 0x2fb   :  { %v1090_v0 = vpop.f32.mrb[33].mxu0 }
 0x2fc   :  { %v1091_v27 = vadd.f32 %v1090_v0, %v1089_v11  ;;  %v1092_v13 = vpop.f32.mrb[34].mxu0 }
 0x2fd   :  { %v1093_v14 = vpop.f32.mrb[35].mxu0 }
 0x2fe   :  { %v911_v28 = vadd.f32 %v1091_v27, %v1615_v12  ;;  %v1094_v15 = vadd.f32 %v1093_v14, %v1092_v13 }
 0x300   :  { %973 = vst [vmem:[#allocation10] sm:$0xff] %v911_v28  ;;  %v914_v16 = vadd.f32 %v1094_v15, %v1615_v12 }
 0x302   :  { %974 = vst [vmem:[#allocation10 + $0x8] sm:$0xff] %v914_v16  ;;  %v1095_v20 = vpop.f32.mrb[36].mxu0 }
 0x303   :  { %v1096_v17 = vpop.f32.mrb[37].mxu0 }
 0x304   :  { %v1097_v25 = vadd.f32 %v1096_v17, %v1095_v20  ;;  %v1098_v23 = vpop.f32.mrb[38].mxu0 }
 0x305   :  { %v1099_v26 = vpop.f32.mrb[39].mxu0 }
 0x306   :  { %v919_v29 = vadd.f32 %v1097_v25, %v1615_v12  ;;  %v1100_v30 = vadd.f32 %v1099_v26, %v1098_v23 }
 0x308   :  { %975 = vst [vmem:[#allocation10 + $0x10] sm:$0xff] %v919_v29  ;;  %v922_v31 = vadd.f32 %v1100_v30, %v1615_v12 }
 0x30a   :  { %976 = vst [vmem:[#allocation10 + $0x18] sm:$0xff] %v922_v31  ;;  %v1101_v32 = vpop.f32.mrb[40].mxu0 }
 0x30b   :  { %v1102_v18 = vpop.f32.mrb[41].mxu0 }
 0x30c   :  { %v1103_v33 = vadd.f32 %v1102_v18, %v1101_v32  ;;  %v1104_v19 = vpop.f32.mrb[42].mxu0 }
 0x30d   :  { %v1105_v34 = vpop.f32.mrb[43].mxu0 }
 0x30e   :  { %v927_v35 = vadd.f32 %v1103_v33, %v1615_v12  ;;  %v1106_v36 = vadd.f32 %v1105_v34, %v1104_v19 }
 0x310   :  { %977 = vst [vmem:[#allocation10 + $0x20] sm:$0xff] %v927_v35  ;;  %v930_v22 = vadd.f32 %v1106_v36, %v1615_v12 }
 0x312   :  { %978 = vst [vmem:[#allocation10 + $0x28] sm:$0xff] %v930_v22  ;;  %v1107_v37 = vpop.f32.mrb[44].mxu0 }
 0x313   :  { %v1108_v38 = vpop.f32.mrb[45].mxu0 }
 0x314   :  { %v1109_v21 = vadd.f32 %v1108_v38, %v1107_v37  ;;  %v1110_v24 = vpop.f32.mrb[46].mxu0 }
 0x315   :  { %v1111_v39 = vpop.f32.mrb[47].mxu0 }
 0x316   :  { %v935_v40 = vadd.f32 %v1109_v21, %v1615_v12  ;;  %v1112_v41 = vadd.f32 %v1111_v39, %v1110_v24 }
 0x318   :  { %979 = vst [vmem:[#allocation10 + $0x30] sm:$0xff] %v935_v40  ;;  %v938_v42 = vadd.f32 %v1112_v41, %v1615_v12 }
 0x31a   :  { %980 = vst [vmem:[#allocation10 + $0x38] sm:$0xff] %v938_v42  ;;  %v1113_v43 = vpop.f32.mrb[48].mxu0 }
 0x31b   :  { %v1114_v44 = vpop.f32.mrb[49].mxu0 }
 0x31c   :  { %v1115_v45 = vadd.f32 %v1114_v44, %v1113_v43  ;;  %v1116_v46 = vpop.f32.mrb[50].mxu0 }
 0x31d   :  { %v1117_v47 = vpop.f32.mrb[51].mxu0 }
 0x31e   :  { %v943_v48 = vadd.f32 %v1115_v45, %v1615_v12  ;;  %v1118_v49 = vadd.f32 %v1117_v47, %v1116_v46 }
 0x320   :  { %981 = vst [vmem:[#allocation10 + $0x40] sm:$0xff] %v943_v48  ;;  %v946_v50 = vadd.f32 %v1118_v49, %v1615_v12 }
 0x322   :  { %982 = vst [vmem:[#allocation10 + $0x48] sm:$0xff] %v946_v50  ;;  %v1119_v51 = vpop.f32.mrb[52].mxu0 }
 0x323   :  { %v1120_v52 = vpop.f32.mrb[53].mxu0 }
 0x324   :  { %v1121_v53 = vadd.f32 %v1120_v52, %v1119_v51  ;;  %v1122_v54 = vpop.f32.mrb[54].mxu0 }
 0x325   :  { %v1123_v55 = vpop.f32.mrb[55].mxu0 }
 0x326   :  { %v951_v56 = vadd.f32 %v1121_v53, %v1615_v12  ;;  %v1124_v57 = vadd.f32 %v1123_v55, %v1122_v54 }
 0x328   :  { %983 = vst [vmem:[#allocation10 + $0x50] sm:$0xff] %v951_v56  ;;  %v954_v58 = vadd.f32 %v1124_v57, %v1615_v12 }
 0x32a   :  { %984 = vst [vmem:[#allocation10 + $0x58] sm:$0xff] %v954_v58  ;;  %v1125_v59 = vpop.f32.mrb[32].mxu1 }
 0x32b   :  { %v1126_v60 = vpop.f32.mrb[33].mxu1 }
 0x32c   :  { %v1127_v61 = vadd.f32 %v1126_v60, %v1125_v59  ;;  %v1128_v62 = vpop.f32.mrb[34].mxu1 }
 0x32d   :  { %v1129_v63 = vpop.f32.mrb[35].mxu1 }
 0x32e   :  { %v959_v1 = vadd.f32 %v1127_v61, %v1615_v12  ;;  %v1130_v2 = vadd.f32 %v1129_v63, %v1128_v62 }
 0x330   :  { %985 = vst [vmem:[#allocation10 + $0x60] sm:$0xff] %v959_v1  ;;  %v962_v3 = vadd.f32 %v1130_v2, %v1615_v12 }
 0x332   :  { %986 = vst [vmem:[#allocation10 + $0x68] sm:$0xff] %v962_v3  ;;  %v1131_v4 = vpop.f32.mrb[36].mxu1 }
 0x333   :  { %v1132_v5 = vpop.f32.mrb[37].mxu1 }
 0x334   :  { %v1133_v6 = vadd.f32 %v1132_v5, %v1131_v4  ;;  %v1134_v7 = vpop.f32.mrb[38].mxu1 }
 0x335   :  { %v1135_v8 = vpop.f32.mrb[39].mxu1 }
 0x336   :  { %v967_v9 = vadd.f32 %v1133_v6, %v1615_v12  ;;  %v1136_v10 = vadd.f32 %v1135_v8, %v1134_v7 }
 0x338   :  { %987 = vst [vmem:[#allocation10 + $0x70] sm:$0xff] %v967_v9  ;;  %v970_v11 = vadd.f32 %v1136_v10, %v1615_v12 }
 0x33a   :  { %988 = vst [vmem:[#allocation10 + $0x78] sm:$0xff] %v970_v11 }
 0x33b   :  { %1350 = shalt.err (!%p1347_p8)
}
 0x33c   :  { %s1351_s15 = scalar_lea.hbm %s1655_s7, 2048 }
 0x33d   :  { %p1352_p9 = scmp.ne.s32.totalorder %s1655_s7, %s1351_s15  ;;  %p1355_p10 = scmp.lt.u32.totalorder %s1351_s15, %s1655_s7 }
 0x33f   :  { %p1357_p11 = pnand %p1355_p10, %p1352_p9 }
 0x341   :  { %1360 = shalt.err (!%p1357_p11)
}
 0x342   :  { %1000 = dma.vmem_to_hbm [thread:$0]  %s995_s9, 2048, %s1655_s7, [#allocation4], %s1371_s13, %s1371_s13, %s1372_s14  }
 0x343   :  { %1367 = dma.done.wait [#allocation4], 2048  }
 0x344   :  { %1368 = vsyncadd [#allocation4], 4294965248 }
 0x345   :  { %1004 = vsyncpa [#allocation3], 1 }
 0x346   :  { %1005 = vsyncpa [#allocation6], 1 }
 0x347   :  { %1006 = vsyncpa [#allocation9], 1 }
 0x348   :  { %1007 = vsyncpa [#allocation4], 1 }

</bundles_post_ra>
